<compile_context>
chip_gen: v5e
topology: v5e:2x2
jax: 0.10.0
libtpu: 0.0.40
codegen_flags: <defaults>
</compile_context>

<pallas_src>
import jax
import jax.numpy as jnp
from jax import lax
from jax.experimental import pallas as pl
from jax.experimental.pallas import tpu as pltpu

D_IN, D_H1, D_H2, D_OUT = 14, 64, 32, 1

_TC = 512        # inner compute chunk (batch columns kept in vregs per pass)
_TB_MAX = 8192   # max batch rows per grid step (fits VMEM budget on v5e/v6e/v7x)


def _choose_tb(batch):
    """Per-grid-step batch tile.

    - tiny batch: single exact tile (block dims == array dims, no padding)
    - otherwise: a multiple of _TC, capped at _TB_MAX, aiming for >= 2 grid
      steps so v7x can shard the 'parallel' axis over both TensorCores.
    """
    if batch <= _TC:
        return batch
    target = min(_TB_MAX, -(-batch // 2))        # ~batch/2, capped
    return max(_TC, (target // _TC) * _TC)       # round down to a _TC multiple


def _make_kernel(tb, tc):
    n_chunks = tb // tc

    def kernel(x_ref, w1_ref, b1_ref, w2_ref, b2_ref, w3_ref, b3_ref, o_ref):
        # Weights/biases are resident VMEM blocks; load once per grid step.
        w1, b1 = w1_ref[...], b1_ref[...]    # (64,14) bf16, (64,1) f32
        w2, b2 = w2_ref[...], b2_ref[...]    # (32,64) bf16, (32,1) f32
        w3, b3 = w3_ref[...], b3_ref[...]    # (1,32)  bf16, (1,1)  f32

        def mlp_chunk(xc):                   # xc: (tc, 14) bf16, batch-major
            # Layer 1: contract the feature dim of BOTH operands -> (64, tc).
            # The x-chunk "transpose" rides the MXU operand staging, so no
            # separate HBM/VMEM transpose pass exists anywhere.
            h1 = lax.dot_general(w1, xc, (((1,), (1,)), ((), ())),
                                 preferred_element_type=jnp.float32)
            h1 = jnp.maximum(h1 + b1, 0.0).astype(jnp.bfloat16)
            # Layer 2: (32,64) @ (64,tc) -> (32,tc)
            h2 = jnp.dot(w2, h1, preferred_element_type=jnp.float32)
            h2 = jnp.maximum(h2 + b2, 0.0).astype(jnp.bfloat16)
            # Layer 3: (1,32) @ (32,tc) -> (1,tc)  (lane-dense result/store)
            return jnp.dot(w3, h2, preferred_element_type=jnp.float32) + b3

        if n_chunks == 1:
            o_ref[...] = mlp_chunk(x_ref[...].astype(jnp.bfloat16)).astype(o_ref.dtype)
        else:
            def body(c, carry):
                start = pl.multiple_of(c * tc, tc)
                xc = x_ref[pl.ds(start, tc), :].astype(jnp.bfloat16)
                o_ref[:, pl.ds(start, tc)] = mlp_chunk(xc).astype(o_ref.dtype)
                return carry
            lax.fori_loop(0, n_chunks, body, 0, unroll=True)

    return kernel


@jax.jit
def simple_fnn_forward(x, params):
    """x: (B, 14) float32.  params: PyTorch-layout weights w_i (out,in), b_i (out,)."""
    B = x.shape[0]
    TB = _choose_tb(B)
    tc = _TC if TB % _TC == 0 else TB
    num_tiles = -(-B // TB)
    B_pad = num_tiles * TB
    if B_pad != B:
        # Only ragged multi-tile batches pay this copy; tile-aligned or tiny
        # (single-tile) batches reach the kernel with zero extra HBM passes.
        x = jnp.pad(x, ((0, B_pad - B), (0, 0)))

    # Weights in PyTorch (out, in) layout, bf16 for the MXU; biases f32 shaped
    # (out, 1) so they broadcast across the lane (batch) axis.
    w1 = params["w1"].astype(jnp.bfloat16)
    w2 = params["w2"].astype(jnp.bfloat16)
    w3 = params["w3"].astype(jnp.bfloat16)
    b1 = params["b1"].reshape(D_H1, 1).astype(jnp.float32)
    b2 = params["b2"].reshape(D_H2, 1).astype(jnp.float32)
    b3 = params["b3"].reshape(D_OUT, 1).astype(jnp.float32)

    const = lambda shape: pl.BlockSpec(shape, lambda i: (0, 0))  # resident in VMEM

    # VMEM budget: double-buffered x tile (14 lanes pad to one 128-lane tile in
    # VMEM) + double-buffered out tile + resident weights + chunk headroom.
    vmem_need = 2 * TB * 128 * 4 + 2 * 8 * TB * 4 + (4 << 20)
    vmem_limit = int(min(max(vmem_need, 32 << 20), 96 << 20))

    out = pl.pallas_call(
        _make_kernel(TB, tc),
        out_shape=jax.ShapeDtypeStruct((D_OUT, B_pad), jnp.float32),
        grid=(num_tiles,),
        in_specs=[
            pl.BlockSpec((TB, D_IN), lambda i: (i, 0)),   # x tile, pipelined over batch
            const((D_H1, D_IN)), const((D_H1, 1)),        # w1, b1 (constant block index)
            const((D_H2, D_H1)), const((D_H2, 1)),        # w2, b2
            const((D_OUT, D_H2)), const((D_OUT, 1)),      # w3, b3
        ],
        out_specs=pl.BlockSpec((D_OUT, TB), lambda i: (0, i)),
        compiler_params=pltpu.CompilerParams(
            dimension_semantics=("parallel",),            # v7x: shard batch over 2 TCs
            vmem_limit_bytes=vmem_limit,
        ),
    )(x, w1, b1, w2, b2, w3, b3)

    # (1, B_pad) -> (B, 1); padded columns are discarded, the reshape is free.
    return out[0, :B].reshape(B, 1)


def init_params(key):
    """Deterministic init mimicking nn.Linear default (uniform +/- 1/sqrt(fan_in)),
    stored in PyTorch layout: W (out, in), b (out,)."""
    dims = [(D_IN, D_H1), (D_H1, D_H2), (D_H2, D_OUT)]
    params = {}
    for i, (fan_in, fan_out) in enumerate(dims, start=1):
        key, kw, kb = jax.random.split(key, 3)
        bound = 1.0 / jnp.sqrt(fan_in)
        params[f"w{i}"] = jax.random.uniform(
            kw, (fan_out, fan_in), jnp.float32, -bound, bound)
        params[f"b{i}"] = jax.random.uniform(
            kb, (fan_out,), jnp.float32, -bound, bound)
    return params


def _reference(x, params):
    """Pure-JAX f32 reference in standard batch-major layout."""
    h = jnp.maximum(x @ params["w1"].T + params["b1"], 0.0)
    h = jnp.maximum(h @ params["w2"].T + params["b2"], 0.0)
    return h @ params["w3"].T + params["b3"]


if __name__ == "__main__":
    key = jax.random.PRNGKey(0)
    key, kx = jax.random.split(key)

    B = 8
    x = jax.random.normal(kx, (B, D_IN), jnp.float32)
    params = init_params(key)

    out = jax.block_until_ready(simple_fnn_forward(x, params))

    ref = _reference(x, params)
    assert out.shape == (B, 1), out.shape
    # bf16 MXU operands -> compare against the f32 reference with bf16-level tolerance.
    assert jnp.allclose(out, ref, atol=2e-2, rtol=2e-2), (out, ref)

    print("KERNEL_OK")
</pallas_src>

<mosaic_0001>
module attributes {stable_mosaic.version = 11 : i64} {
  func.func @kernel(%arg0: i32, %arg1: memref<8x14xf32, #tpu.memory_space<vmem>>, %arg2: memref<64x14xbf16, #tpu.memory_space<vmem>>, %arg3: memref<64x1xf32, #tpu.memory_space<vmem>>, %arg4: memref<32x64xbf16, #tpu.memory_space<vmem>>, %arg5: memref<32x1xf32, #tpu.memory_space<vmem>>, %arg6: memref<1x32xbf16, #tpu.memory_space<vmem>>, %arg7: memref<1x1xf32, #tpu.memory_space<vmem>>, %arg8: memref<1x8xf32, #tpu.memory_space<vmem>>) attributes {dimension_semantics = [#tpu.dimension_semantics<parallel>], iteration_bounds = array<i64: 1>, scalar_prefetch = 0 : i64, scratch_operands = 0 : i64, tpu.core_type = #tpu.core_type<tc>, window_params = [{transform_indices = @transform_0, window_bounds = array<i64: 8, 14>}, {pipeline_mode = #tpu.pipeline_mode<synchronous>, transform_indices = @transform_1, window_bounds = array<i64: 64, 14>}, {pipeline_mode = #tpu.pipeline_mode<synchronous>, transform_indices = @transform_2, window_bounds = array<i64: 64, 1>}, {pipeline_mode = #tpu.pipeline_mode<synchronous>, transform_indices = @transform_3, window_bounds = array<i64: 32, 64>}, {pipeline_mode = #tpu.pipeline_mode<synchronous>, transform_indices = @transform_4, window_bounds = array<i64: 32, 1>}, {pipeline_mode = #tpu.pipeline_mode<synchronous>, transform_indices = @transform_5, window_bounds = array<i64: 1, 32>}, {pipeline_mode = #tpu.pipeline_mode<synchronous>, transform_indices = @transform_6, window_bounds = array<i64: 1, 1>}, {transform_indices = @transform_7, window_bounds = array<i64: 1, 8>}]} {
    %c0 = arith.constant 0 : index
    %c0_0 = arith.constant 0 : index
    %0 = vector.load %arg2[%c0, %c0_0] : memref<64x14xbf16, #tpu.memory_space<vmem>>, vector<64x14xbf16>
    %c0_1 = arith.constant 0 : index
    %c0_2 = arith.constant 0 : index
    %1 = vector.load %arg3[%c0_1, %c0_2] : memref<64x1xf32, #tpu.memory_space<vmem>>, vector<64x1xf32>
    %c0_3 = arith.constant 0 : index
    %c0_4 = arith.constant 0 : index
    %2 = vector.load %arg4[%c0_3, %c0_4] : memref<32x64xbf16, #tpu.memory_space<vmem>>, vector<32x64xbf16>
    %c0_5 = arith.constant 0 : index
    %c0_6 = arith.constant 0 : index
    %3 = vector.load %arg5[%c0_5, %c0_6] : memref<32x1xf32, #tpu.memory_space<vmem>>, vector<32x1xf32>
    %c0_7 = arith.constant 0 : index
    %c0_8 = arith.constant 0 : index
    %4 = vector.load %arg6[%c0_7, %c0_8] : memref<1x32xbf16, #tpu.memory_space<vmem>>, vector<1x32xbf16>
    %c0_9 = arith.constant 0 : index
    %c0_10 = arith.constant 0 : index
    %5 = vector.load %arg7[%c0_9, %c0_10] : memref<1x1xf32, #tpu.memory_space<vmem>>, vector<1x1xf32>
    %c0_11 = arith.constant 0 : index
    %c0_12 = arith.constant 0 : index
    %6 = vector.load %arg1[%c0_11, %c0_12] : memref<8x14xf32, #tpu.memory_space<vmem>>, vector<8x14xf32>
    %7 = arith.truncf %6 : vector<8x14xf32> to vector<8x14xbf16>
    %cst = arith.constant dense<0.000000e+00> : vector<64x8xf32>
    %8 = tpu.matmul %0, %7, %cst {dimension_numbers = #tpu.dot_dimension_numbers<[1], [1], [0], [0], [0, 0, 1, 0], [], []>} : vector<64x14xbf16>, vector<8x14xbf16>, vector<64x8xf32> -> vector<64x8xf32>
    %9 = vector.broadcast %1 : vector<64x1xf32> to vector<64x8xf32>
    %10 = arith.addf %8, %9 : vector<64x8xf32>
    %cst_13 = arith.constant 0.000000e+00 : f32
    %11 = vector.broadcast %cst_13 : f32 to vector<64x8xf32>
    %12 = arith.maximumf %10, %11 : vector<64x8xf32>
    %13 = arith.truncf %12 : vector<64x8xf32> to vector<64x8xbf16>
    %cst_14 = arith.constant dense<0.000000e+00> : vector<32x8xf32>
    %14 = tpu.matmul %2, %13, %cst_14 {dimension_numbers = #tpu.dot_dimension_numbers<[1], [0], [0], [1], [0, 0, 1, 1], [], []>} : vector<32x64xbf16>, vector<64x8xbf16>, vector<32x8xf32> -> vector<32x8xf32>
    %15 = vector.broadcast %3 : vector<32x1xf32> to vector<32x8xf32>
    %16 = arith.addf %14, %15 : vector<32x8xf32>
    %cst_15 = arith.constant 0.000000e+00 : f32
    %17 = vector.broadcast %cst_15 : f32 to vector<32x8xf32>
    %18 = arith.maximumf %16, %17 : vector<32x8xf32>
    %19 = arith.truncf %18 : vector<32x8xf32> to vector<32x8xbf16>
    %cst_16 = arith.constant dense<0.000000e+00> : vector<1x8xf32>
    %20 = tpu.matmul %4, %19, %cst_16 {dimension_numbers = #tpu.dot_dimension_numbers<[1], [0], [0], [1], [0, 0, 1, 1], [], []>} : vector<1x32xbf16>, vector<32x8xbf16>, vector<1x8xf32> -> vector<1x8xf32>
    %21 = vector.broadcast %5 : vector<1x1xf32> to vector<1x8xf32>
    %22 = arith.addf %20, %21 : vector<1x8xf32>
    %c0_17 = arith.constant 0 : index
    %c0_18 = arith.constant 0 : index
    %23 = vector.load %arg8[%c0_17, %c0_18] : memref<1x8xf32, #tpu.memory_space<vmem>>, vector<1x8xf32>
    tpu.vector_store %arg8[%c0_17, %c0_18], %22 {strides = array<i32>} : memref<1x8xf32, #tpu.memory_space<vmem>>, vector<1x8xf32>,
    return
  }
  func.func @transform_0(%arg0: i32) -> (i32, i32) {
    %c0_i32 = arith.constant 0 : i32
    %c0_i32_0 = arith.constant 0 : i32
    return %arg0, %c0_i32 : i32, i32
  }
  func.func @transform_1(%arg0: i32) -> (i32, i32) {
    %c0_i32 = arith.constant 0 : i32
    %c0_i32_0 = arith.constant 0 : i32
    %c0_i32_1 = arith.constant 0 : i32
    return %c0_i32, %c0_i32_0 : i32, i32
  }
  func.func @transform_2(%arg0: i32) -> (i32, i32) {
    %c0_i32 = arith.constant 0 : i32
    %c0_i32_0 = arith.constant 0 : i32
    %c0_i32_1 = arith.constant 0 : i32
    return %c0_i32, %c0_i32_0 : i32, i32
  }
  func.func @transform_3(%arg0: i32) -> (i32, i32) {
    %c0_i32 = arith.constant 0 : i32
    %c0_i32_0 = arith.constant 0 : i32
    %c0_i32_1 = arith.constant 0 : i32
    return %c0_i32, %c0_i32_0 : i32, i32
  }
  func.func @transform_4(%arg0: i32) -> (i32, i32) {
    %c0_i32 = arith.constant 0 : i32
    %c0_i32_0 = arith.constant 0 : i32
    %c0_i32_1 = arith.constant 0 : i32
    return %c0_i32, %c0_i32_0 : i32, i32
  }
  func.func @transform_5(%arg0: i32) -> (i32, i32) {
    %c0_i32 = arith.constant 0 : i32
    %c0_i32_0 = arith.constant 0 : i32
    %c0_i32_1 = arith.constant 0 : i32
    return %c0_i32, %c0_i32_0 : i32, i32
  }
  func.func @transform_6(%arg0: i32) -> (i32, i32) {
    %c0_i32 = arith.constant 0 : i32
    %c0_i32_0 = arith.constant 0 : i32
    %c0_i32_1 = arith.constant 0 : i32
    return %c0_i32, %c0_i32_0 : i32, i32
  }
  func.func @transform_7(%arg0: i32) -> (i32, i32) {
    %c0_i32 = arith.constant 0 : i32
    %c0_i32_0 = arith.constant 0 : i32
    return %c0_i32, %arg0 : i32, i32
  }
}

</mosaic_0001>

<bundles_post_ra>
// kernel: simple_fnn_forward.1
= control target key start
LH: loop header
LB: loop body
LE: loop exit
PB: predicated region body
PF: predicated region fallthrough
CT: control target
= control target key end

     0   :  { %s460_s0 = inlined_call_operand.vmem [shape: f32[8,14], index: 0, kind: input, shape index: {}]   ;;  %s461_s1 = inlined_call_operand.vmem [shape: bf16[64,14], index: 1, kind: input, shape index: {}]   ;;  %s462_s2 = inlined_call_operand.vmem [shape: f32[64,1], index: 2, kind: input, shape index: {}]   ;;  %s463_s3 = inlined_call_operand.vmem [shape: bf16[32,64], index: 3, kind: input, shape index: {}]   ;;  %s464_s4 = inlined_call_operand.vmem [shape: f32[32,1], index: 4, kind: input, shape index: {}]   ;;  %s465_s5 = inlined_call_operand.vmem [shape: bf16[1,32], index: 5, kind: input, shape index: {}]   ;;  %s466_s6 = inlined_call_operand.<no memory space> [shape: f32[1,1], index: 6, kind: input, shape index: {}]   ;;  %s467_s7 = inlined_call_operand.hbm [shape: f32[1,8], index: 7, kind: output, shape index: {}]  }
   0x1   :  { %v12_v0 = vstv %s466_s6 }
   0x2   :  { %13 = vst [vmem:[#allocation2] sm:$0x1] %v12_v0 }
   0x3   :  { %v56_v1 = vld [vmem:[%s460_s0] sm:$0xff]  ;;  %vm118_vm0 = vcmask 113664   ;;  %v44_v2 = vld [vmem:[%s462_s2 + $0x30] sm:$0xff]  ;;  %v347_v4 = vmov 0  }
   0x4   :  { %v57_v3 = vpack.c.bf16 %v56_v1, %v56_v1  ;;  %318 = vset.pattern.permute.xlu0 %v347_v4  ;;  %319 = vset.pattern.permute.xlu1 %v347_v4  ;;  %v42_v5 = vld [vmem:[%s462_s2 + $0x20] sm:$0xff]  ;;  %v40_v7 = vld [vmem:[%s462_s2 + $0x10] sm:$0xff] }
   0x5   :  { %90 = vperm.xlu0 %318, %v44_v2   ;;  %80 = vperm.xlu1 %319, %v42_v5   ;;  %v311_v8 = vld [vmem:[%s461_s1 + $0x10] sm:$0xff] }
   0x6   :  { %v132_v6 = vsel %vm118_vm0, %v57_v3, 0  ;;  %320 = vset.pattern.permute.xlu2 %v347_v4 }
   0x7   :  { %315 = vmatpush.bf16.xpose.msra.mxu3 %v132_v6  ;;  %141 = vmatpush.bf16.xpose.msra.mxu0 %v132_v6 }
   0x8   :  { %70 = vperm.xlu2 %320, %v40_v7  }
   0x9   :  { %14 = vsyncpa [#allocation4], 0  ;;  %v309_v9 = vld [vmem:[%s461_s1] sm:$0xff]  ;;  %v45_v10 = vld [vmem:[%s462_s2 + $0x38] sm:$0xff]  ;;  %vm205_vm1 = vcmask 523264   ;;  %vm243_vm2 = vcmask 261120  }
   0xa   :  { %v43_v11 = vld [vmem:[%s462_s2 + $0x28] sm:$0xff]  ;;  %v41_v12 = vld [vmem:[%s462_s2 + $0x18] sm:$0xff]  ;;  %v38_v13 = vld [vmem:[%s462_s2] sm:$0xff]  ;;  %s348_s12 = smov [#allocation3]   ;;  %s269_s16 = sshll.u32 %s467_s7, 4  ;;  %vm260_vm3 = vcmask 57344   ;;  %s270_s16 = int_to_ptr.hbm [resolvable:$true] %s269_s16 }
   0xb   :  { %v39_v14 = vld [vmem:[%s462_s2 + $0x8] sm:$0xff]  ;;  %v52_v15 = vld [vmem:[%s464_s4 + $0x10] sm:$0xff]  ;;  %v312_v16 = vld [vmem:[%s461_s1 + $0x18] sm:$0xff]  ;;  %s267_s13 = sshll.u32 %s348_s12, 4  ;;  %s268_s13 = int_to_ptr.vmem [resolvable:$true] %s267_s13 }
   0xc   :  { %v310_v17 = vld [vmem:[%s461_s1 + $0x8] sm:$0xff]  ;;  %v53_v18 = vld [vmem:[%s464_s4 + $0x18] sm:$0xff]  ;;  %v50_v19 = vld [vmem:[%s464_s4] sm:$0xff] }
   0xd   :  { %95 = vperm.xlu0 %318, %v45_v10   ;;  %85 = vperm.xlu1 %319, %v43_v11   ;;  %v51_v20 = vld [vmem:[%s464_s4 + $0x8] sm:$0xff]  ;;  %v55_v21 = vld [vmem:[#allocation2] sm:$0x1] }
   0xe   :  { %296 = vmatmul.msk.bf16.vlgmr.msra.gmra.mxu3 %vm118_vm0, %v311_v8  ;;  %294 = vmatmul.msk.bf16.vlgmr.msra.gmra.mxu0 %vm118_vm0, %v309_v9  ;;  %v313_v58 = vld [vmem:[%s463_s3] sm:$0xff]  ;;  %v314_v59 = vld [vmem:[%s463_s3 + $0x8] sm:$0xff] }
  0x10   :  { %75 = vperm.xlu2 %320, %v41_v12  }
  0x15   :  { %60 = vperm.xlu0 %318, %v38_v13   ;;  %65 = vperm.xlu1 %319, %v39_v14   ;;  %v54_v14 = vld [vmem:[%s465_s5] sm:$0x1] }
  0x18   :  { %187 = vperm.xlu2 %320, %v52_v15  }
  0x1d   :  { %192 = vperm.xlu0 %318, %v53_v18   ;;  %177 = vperm.xlu1 %319, %v50_v19  }
  0x1e   :  { %297 = vmatmul.msk.bf16.gmra.mxu3 %vm118_vm0, %v312_v16  ;;  %295 = vmatmul.msk.bf16.gmra.mxu0 %vm118_vm0, %v310_v17 }
  0x20   :  { %182 = vperm.xlu2 %320, %v51_v20  }
  0x25   :  { %239 = vperm.xlu0 %318, %v55_v21  }
  0x62   :  { %v71_v30 = vpop.permute.xlu2 %70 }
  0x6a   :  { %v76_v41 = vpop.permute.xlu2 %75 }
  0x72   :  { %v188_v62 = vpop.permute.xlu2 %187 }
  0x77   :  { %v81_v26 = vpop.permute.xlu1 %80  ;;  %v91_v27 = vpop.permute.xlu0 %90 }
  0x7a   :  { %v183_v0 = vpop.permute.xlu2 %182 }
  0x7f   :  { %v86_v31 = vpop.permute.xlu1 %85  ;;  %v96_v32 = vpop.permute.xlu0 %95 }
  0x87   :  { %v66_v46 = vpop.permute.xlu1 %65  ;;  %v61_v47 = vpop.permute.xlu0 %60 }
  0x8b   :  { %v143_v22 = vpop.f32.mrf.mxu0 }
  0x8c   :  { %v144_v49 = vadd.f32 %v143_v22, %v61_v47 }
  0x8e   :  { %v163_v54 = vmax.f32 %v144_v49, 0.0 }
  0x8f   :  { %v193_v2 = vpop.permute.xlu0 %192  ;;  %v178_v6 = vpop.permute.xlu1 %177 }
  0x91   :  { %v153_v23 = vpop.f32.mrf.mxu3 }
  0x92   :  { %v154_v38 = vadd.f32 %v153_v23, %v81_v26 }
  0x93   :  { %v145_v24 = vpop.f32.mrf.mxu0 }
  0x94   :  { %v167_v48 = vmax.f32 %v154_v38, 0.0  ;;  %v146_v50 = vadd.f32 %v145_v24, %v66_v46 }
  0x96   :  { %v164_v55 = vmax.f32 %v146_v50, 0.0 }
  0x97   :  { %v240_v15 = vpop.permute.xlu0 %239 }
  0x98   :  { %v171_v57 = vpack.c.bf16 %v164_v55, %v163_v54  ;;  %v242_v16 = vperm.slane %v240_v15, 0 }
  0x99   :  { %v155_v25 = vpop.f32.mrf.mxu3 }
  0x9a   :  { %v156_v35 = vadd.f32 %v155_v25, %v86_v31 }
  0x9b   :  { %v148_v28 = vpop.f32.mrf.mxu0 }
  0x9c   :  { %v168_v42 = vmax.f32 %v156_v35, 0.0  ;;  %v149_v43 = vadd.f32 %v148_v28, %v71_v30 }
  0x9e   :  { %v165_v51 = vmax.f32 %v149_v43, 0.0  ;;  %v173_v53 = vpack.c.bf16 %v168_v42, %v167_v48 }
  0xa1   :  { %v158_v29 = vpop.f32.mrf.mxu3 }
  0xa2   :  { %v159_v33 = vadd.f32 %v158_v29, %v91_v27 }
  0xa3   :  { %v150_v37 = vpop.f32.mrf.mxu0 }
  0xa4   :  { %v169_v39 = vmax.f32 %v159_v33, 0.0  ;;  %v151_v44 = vadd.f32 %v150_v37, %v76_v41 }
  0xa6   :  { %v166_v52 = vmax.f32 %v151_v44, 0.0 }
  0xa8   :  { %v172_v56 = vpack.c.bf16 %v166_v52, %v165_v51 }
  0xa9   :  { %v160_v34 = vpop.f32.mrf.mxu3 }
  0xaa   :  { %v161_v36 = vadd.f32 %v160_v34, %v96_v32 }
  0xac   :  { %v170_v40 = vmax.f32 %v161_v36, 0.0 }
  0xae   :  { %v174_v45 = vpack.c.bf16 %v170_v40, %v169_v39 }
  0xb0   :  { %216 = vmatpush.bf16.msra.mxu1 %v174_v45 }
  0xb4   :  { %217 = vmatpush.bf16.msra.mxu1 %v173_v53 }
  0xb8   :  { %218 = vmatpush.bf16.msra.mxu1 %v172_v56 }
  0xbc   :  { %219 = vmatpush.bf16.msra.mxu1 %v171_v57 }
  0xbf   :  { %306 = vmatmul.msk.bf16.vlgmr.msra.gmra.mxu1 %vm205_vm1, %v313_v58 }
  0xcf   :  { %307 = vmatmul.msk.bf16.gmra.mxu1 %vm205_vm1, %v314_v59 }
 0x13c   :  { %v221_v60 = vpop.f32.mrf.mxu1 }
 0x13d   :  { %v222_v7 = vadd.f32 %v221_v60, %v178_v6 }
 0x13f   :  { %v231_v12 = vmax.f32 %v222_v7, 0.0 }
 0x144   :  { %v223_v61 = vpop.f32.mrf.mxu1 }
 0x145   :  { %v224_v4 = vadd.f32 %v223_v61, %v183_v0 }
 0x147   :  { %v232_v10 = vmax.f32 %v224_v4, 0.0 }
 0x149   :  { %v235_v13 = vpack.c.bf16 %v232_v10, %v231_v12 }
 0x14c   :  { %v226_v63 = vpop.f32.mrf.mxu1 }
 0x14d   :  { %v227_v1 = vadd.f32 %v226_v63, %v188_v62 }
 0x14f   :  { %v233_v8 = vmax.f32 %v227_v1, 0.0 }
 0x154   :  { %v228_v3 = vpop.f32.mrf.mxu1 }
 0x155   :  { %v229_v5 = vadd.f32 %v228_v3, %v193_v2 }
 0x157   :  { %v234_v9 = vmax.f32 %v229_v5, 0.0 }
 0x159   :  { %v236_v11 = vpack.c.bf16 %v234_v9, %v233_v8 }
 0x15b   :  { %253 = vmatpush.bf16.msra.mxu2 %v236_v11 }
 0x15f   :  { %254 = vmatpush.bf16.msra.mxu2 %v235_v13 }
 0x162   :  { %308 = vmatmul.msk.bf16.vlgmr.msra.gmra.mxu2 %vm243_vm2, %v54_v14 }
 0x1e5   :  { %v256_v17 = vpop.f32.mrf.mxu2 }
 0x1e6   :  { %v257_v18 = vadd.f32 %v256_v17, %v242_v16 }
 0x1e8   :  { %261 = vst.msk [vmem:[#allocation3] sm:$0x1] %vm260_vm3, %v257_v18 }
 0x1e9   :  { %272 = dma.vmem_to_hbm [thread:$0]  %s268_s13, 16, %s270_s16, [#allocation4]  }
 0x1ed   :  { %v258_v19 = vpop.f32.mrf.mxu2 }
 0x1ee   :  { %345 = dma.done.wait [#allocation4], 16  }
 0x1ef   :  { %346 = vsyncadd [#allocation4], 4294967280 }
 0x1f0   :  { %277 = vsyncpa [#allocation4], 1 }

</bundles_post_ra>
